<compile_context>
chip_gen: v7x
topology: tpu7x:2x2x1
jax: 0.10.0
libtpu: 0.0.40
codegen_flags: <defaults>
</compile_context>

<pallas_src>
import math

import jax
import jax.numpy as jnp
from jax.experimental import pallas as pl
from jax.experimental.pallas import tpu as pltpu

OUT_DIM = 2                      # true output width of the last Linear
W3_LANE_PAD = 128                # last-layer weight padded to a full lane width for the MXU
MAX_TB = 4096                    # max batch-tile rows (2K-8K all amortize per-step overhead)
VMEM_BUDGET = 24 * 1024 * 1024   # conservative vs v7x's ~32 MiB default scoped VMEM


def _mlp_kernel(x_ref, w1_ref, b1_ref, w2_ref, b2_ref, w3_ref, b3_ref, o_ref):
    """One (TB, F) batch tile of the 3-layer MLP.

    x_ref : (TB, F)               concatenated [state_flat, goal] rows
    w1_ref: (F, H),   b1_ref: (1, H)
    w2_ref: (H, H),   b2_ref: (1, H)
    w3_ref: (H, 128)  zero-padded, b3_ref: (1, 128) zero-padded
    o_ref : (TB, 2)               only the 2 true output lanes are written back
    """
    x = x_ref[...]
    h1 = jnp.maximum(
        jnp.dot(x, w1_ref[...], preferred_element_type=jnp.float32) + b1_ref[...], 0.0)
    # Dropout(p=0.1) is identity in eval mode.
    # TODO(synk): stateful pltpu.prng_* dropout masking for train-mode parity.
    h2 = jnp.maximum(
        jnp.dot(h1, w2_ref[...], preferred_element_type=jnp.float32) + b2_ref[...], 0.0)
    y = jnp.dot(h2, w3_ref[...], preferred_element_type=jnp.float32) + b3_ref[...]
    # Padded lanes of W3/b3 are exactly zero; store only the true 2 output lanes
    # (64x less HBM writeback than storing the padded 128-lane block).
    o_ref[...] = y[:, :OUT_DIM].astype(o_ref.dtype)


def prepare_params(w1, b1, w2, b2, w3, b3):
    """Cast to f32, give biases a (1, fan_out) shape, pad layer 3 to 128 MXU lanes."""
    h = w2.shape[0]
    w1 = jnp.asarray(w1, jnp.float32)
    w2 = jnp.asarray(w2, jnp.float32)
    b1 = jnp.asarray(b1, jnp.float32).reshape(1, -1)
    b2 = jnp.asarray(b2, jnp.float32).reshape(1, -1)
    w3p = jnp.zeros((h, W3_LANE_PAD), jnp.float32).at[:, :OUT_DIM].set(
        jnp.asarray(w3, jnp.float32))
    b3p = jnp.zeros((1, W3_LANE_PAD), jnp.float32).at[:, :OUT_DIM].set(
        jnp.asarray(b3, jnp.float32).reshape(1, -1))
    return (w1, b1, w2, b2, w3p, b3p)


def _choose_tile(batch, feat, hidden):
    """Batch-tile rows: big tiles for big batches, >=2 grid steps for moderate ones."""
    tb = -(-batch // 2)               # cdiv(batch, 2): keep both v7x cores busy
    tb = ((tb + 7) // 8) * 8          # sublane multiple
    tb = max(8, min(tb, MAX_TB))
    # Rough VMEM budget: double-buffered in/out tiles plus in-kernel f32 activations.
    row_bytes = 4 * (2 * (feat + OUT_DIM) + 2 * hidden + W3_LANE_PAD)
    cap = max(8, (VMEM_BUDGET // row_bytes) // 8 * 8)
    return min(tb, cap)


def simple_actor_forward_batched(states, goals, params):
    """states: (B, num_objects, state_size), goals: (B, goal_size) -> (B, 2) f32."""
    w1, b1, w2, b2, w3p, b3p = params
    B = states.shape[0]
    # Single wide input stream (cheap fused XLA concat) instead of two narrow DMA streams.
    x = jnp.concatenate(
        [states.reshape(B, -1).astype(jnp.float32), goals.astype(jnp.float32)], axis=1)
    F = x.shape[1]
    H = w2.shape[0]
    assert w1.shape == (F, H)

    tb = _choose_tile(B, F, H)
    grid = (pl.cdiv(B, tb),)          # ragged last block is masked by Pallas: no jnp.pad.

    const_map = lambda i: (0, 0)      # weight blocks never change -> fetched once.
    out = pl.pallas_call(
        _mlp_kernel,
        out_shape=jax.ShapeDtypeStruct((B, OUT_DIM), jnp.float32),
        grid=grid,
        in_specs=[
            pl.BlockSpec((tb, F), lambda i: (i, 0)),
            pl.BlockSpec(w1.shape, const_map),
            pl.BlockSpec(b1.shape, const_map),
            pl.BlockSpec(w2.shape, const_map),
            pl.BlockSpec(b2.shape, const_map),
            pl.BlockSpec(w3p.shape, const_map),
            pl.BlockSpec(b3p.shape, const_map),
        ],
        out_specs=pl.BlockSpec((tb, OUT_DIM), lambda i: (i, 0)),
        compiler_params=pltpu.CompilerParams(dimension_semantics=("parallel",)),
    )(x, w1, b1, w2, b2, w3p, b3p)
    return out


def simple_actor_forward(state, goal, params):
    """Original module signature: (num_objects, state_size) state, (goal_size,) goal -> (2,)."""
    return simple_actor_forward_batched(state[None], goal[None], params)[0]


def init_params(key, state_size, num_objects, goal_size, hidden_dim):
    """Deterministic init matching nn.Linear's U(-1/sqrt(fan_in), 1/sqrt(fan_in))."""
    in_dim = state_size * num_objects + goal_size

    def linear(k, fan_in, fan_out):
        kw, kb = jax.random.split(k)
        bound = 1.0 / math.sqrt(fan_in)
        w = jax.random.uniform(kw, (fan_in, fan_out), jnp.float32, -bound, bound)
        b = jax.random.uniform(kb, (1, fan_out), jnp.float32, -bound, bound)
        return w, b

    k1, k2, k3 = jax.random.split(key, 3)
    w1, b1 = linear(k1, in_dim, hidden_dim)
    w2, b2 = linear(k2, hidden_dim, hidden_dim)
    w3, b3 = linear(k3, hidden_dim, 2)
    return (w1, b1, w2, b2, w3, b3)


def _reference(states, goals, raw):
    w1, b1, w2, b2, w3, b3 = raw
    b = states.shape[0]
    x = jnp.concatenate([states.reshape(b, -1), goals], axis=1)
    h = jnp.maximum(x @ w1 + b1, 0.0)
    h = jnp.maximum(h @ w2 + b2, 0.0)
    return h @ w3 + b3


if __name__ == "__main__":
    # Small shapes consistent with the module.
    state_size, num_objects, goal_size, hidden_dim = 4, 4, 8, 32
    batch = 2

    key = jax.random.PRNGKey(0)
    k_params, k_state, k_goal = jax.random.split(key, 3)

    raw = init_params(k_params, state_size, num_objects, goal_size, hidden_dim)
    params = prepare_params(*raw)

    states = jax.random.normal(k_state, (batch, num_objects, state_size), jnp.float32)
    goals = jax.random.normal(k_goal, (batch, goal_size), jnp.float32)

    # Batched kernel call (single tile).
    out_b = simple_actor_forward_batched(states, goals, params)
    # Single-sample call (exactly the original module's forward signature).
    out_1 = simple_actor_forward(states[0], goals[0], params)

    # A slightly larger batch to exercise multi-tile grid + ragged (masked) last block.
    batch2 = 20
    k_state2, k_goal2 = jax.random.split(jax.random.PRNGKey(1))
    states2 = jax.random.normal(k_state2, (batch2, num_objects, state_size), jnp.float32)
    goals2 = jax.random.normal(k_goal2, (batch2, goal_size), jnp.float32)
    out_b2 = simple_actor_forward_batched(states2, goals2, params)

    jax.block_until_ready((out_b, out_1, out_b2))

    ref = _reference(states, goals, raw)
    ref2 = _reference(states2, goals2, raw)

    assert out_b.shape == (batch, 2)
    assert out_1.shape == (2,)
    assert out_b2.shape == (batch2, 2)
    assert jnp.allclose(out_b, ref, atol=1e-5, rtol=1e-5)
    assert jnp.allclose(out_1, ref[0], atol=1e-5, rtol=1e-5)
    assert jnp.allclose(out_b2, ref2, atol=1e-5, rtol=1e-5)

    print("KERNEL_OK")
</pallas_src>

<mosaic_0001>
module attributes {stable_mosaic.version = 11 : i64} {
  func.func @_mlp_kernel(%arg0: i32, %arg1: memref<8x24xf32, #tpu.memory_space<vmem>>, %arg2: memref<24x32xf32, #tpu.memory_space<vmem>>, %arg3: memref<1x32xf32, #tpu.memory_space<vmem>>, %arg4: memref<32x32xf32, #tpu.memory_space<vmem>>, %arg5: memref<1x32xf32, #tpu.memory_space<vmem>>, %arg6: memref<32x128xf32, #tpu.memory_space<vmem>>, %arg7: memref<1x128xf32, #tpu.memory_space<vmem>>, %arg8: memref<8x2xf32, #tpu.memory_space<vmem>>) attributes {dimension_semantics = [#tpu.dimension_semantics<parallel>], iteration_bounds = array<i64: 1>, scalar_prefetch = 0 : i64, scratch_operands = 0 : i64, tpu.core_type = #tpu.core_type<tc>, window_params = [{transform_indices = @transform_0, window_bounds = array<i64: 8, 24>}, {pipeline_mode = #tpu.pipeline_mode<synchronous>, transform_indices = @transform_1, window_bounds = array<i64: 24, 32>}, {pipeline_mode = #tpu.pipeline_mode<synchronous>, transform_indices = @transform_2, window_bounds = array<i64: 1, 32>}, {pipeline_mode = #tpu.pipeline_mode<synchronous>, transform_indices = @transform_3, window_bounds = array<i64: 32, 32>}, {pipeline_mode = #tpu.pipeline_mode<synchronous>, transform_indices = @transform_4, window_bounds = array<i64: 1, 32>}, {pipeline_mode = #tpu.pipeline_mode<synchronous>, transform_indices = @transform_5, window_bounds = array<i64: 32, 128>}, {pipeline_mode = #tpu.pipeline_mode<synchronous>, transform_indices = @transform_6, window_bounds = array<i64: 1, 128>}, {transform_indices = @transform_7, window_bounds = array<i64: 8, 2>}]} {
    %c0 = arith.constant 0 : index
    %c0_0 = arith.constant 0 : index
    %0 = vector.load %arg1[%c0, %c0_0] : memref<8x24xf32, #tpu.memory_space<vmem>>, vector<8x24xf32>
    %c0_1 = arith.constant 0 : index
    %c0_2 = arith.constant 0 : index
    %1 = vector.load %arg2[%c0_1, %c0_2] : memref<24x32xf32, #tpu.memory_space<vmem>>, vector<24x32xf32>
    %cst = arith.constant dense<0.000000e+00> : vector<8x32xf32>
    %2 = tpu.matmul %0, %1, %cst {dimension_numbers = #tpu.dot_dimension_numbers<[1], [0], [0], [1], [0, 0, 1, 1], [], []>} : vector<8x24xf32>, vector<24x32xf32>, vector<8x32xf32> -> vector<8x32xf32>
    %c0_3 = arith.constant 0 : index
    %c0_4 = arith.constant 0 : index
    %3 = vector.load %arg3[%c0_3, %c0_4] : memref<1x32xf32, #tpu.memory_space<vmem>>, vector<1x32xf32>
    %4 = vector.broadcast %3 : vector<1x32xf32> to vector<8x32xf32>
    %5 = arith.addf %2, %4 : vector<8x32xf32>
    %cst_5 = arith.constant 0.000000e+00 : f32
    %6 = vector.broadcast %cst_5 : f32 to vector<8x32xf32>
    %7 = arith.maximumf %5, %6 : vector<8x32xf32>
    %c0_6 = arith.constant 0 : index
    %c0_7 = arith.constant 0 : index
    %8 = vector.load %arg4[%c0_6, %c0_7] : memref<32x32xf32, #tpu.memory_space<vmem>>, vector<32x32xf32>
    %cst_8 = arith.constant dense<0.000000e+00> : vector<8x32xf32>
    %9 = tpu.matmul %7, %8, %cst_8 {dimension_numbers = #tpu.dot_dimension_numbers<[1], [0], [0], [1], [0, 0, 1, 1], [], []>} : vector<8x32xf32>, vector<32x32xf32>, vector<8x32xf32> -> vector<8x32xf32>
    %c0_9 = arith.constant 0 : index
    %c0_10 = arith.constant 0 : index
    %10 = vector.load %arg5[%c0_9, %c0_10] : memref<1x32xf32, #tpu.memory_space<vmem>>, vector<1x32xf32>
    %11 = vector.broadcast %10 : vector<1x32xf32> to vector<8x32xf32>
    %12 = arith.addf %9, %11 : vector<8x32xf32>
    %cst_11 = arith.constant 0.000000e+00 : f32
    %13 = vector.broadcast %cst_11 : f32 to vector<8x32xf32>
    %14 = arith.maximumf %12, %13 : vector<8x32xf32>
    %c0_12 = arith.constant 0 : index
    %c0_13 = arith.constant 0 : index
    %15 = vector.load %arg6[%c0_12, %c0_13] : memref<32x128xf32, #tpu.memory_space<vmem>>, vector<32x128xf32>
    %cst_14 = arith.constant dense<0.000000e+00> : vector<8x128xf32>
    %16 = tpu.matmul %14, %15, %cst_14 {dimension_numbers = #tpu.dot_dimension_numbers<[1], [0], [0], [1], [0, 0, 1, 1], [], []>} : vector<8x32xf32>, vector<32x128xf32>, vector<8x128xf32> -> vector<8x128xf32>
    %c0_15 = arith.constant 0 : index
    %c0_16 = arith.constant 0 : index
    %17 = vector.load %arg7[%c0_15, %c0_16] : memref<1x128xf32, #tpu.memory_space<vmem>>, vector<1x128xf32>
    %18 = vector.broadcast %17 : vector<1x128xf32> to vector<8x128xf32>
    %19 = arith.addf %16, %18 : vector<8x128xf32>
    %20 = vector.extract_strided_slice %19 {offsets = [0, 0], sizes = [8, 2], strides = [1, 1]} : vector<8x128xf32> to vector<8x2xf32>
    %c0_17 = arith.constant 0 : index
    %c0_18 = arith.constant 0 : index
    %21 = vector.load %arg8[%c0_17, %c0_18] : memref<8x2xf32, #tpu.memory_space<vmem>>, vector<8x2xf32>
    tpu.vector_store %arg8[%c0_17, %c0_18], %20 {strides = array<i32>} : memref<8x2xf32, #tpu.memory_space<vmem>>, vector<8x2xf32>,
    return
  }
  func.func @transform_0(%arg0: i32) -> (i32, i32) {
    %c0_i32 = arith.constant 0 : i32
    %c0_i32_0 = arith.constant 0 : i32
    return %arg0, %c0_i32 : i32, i32
  }
  func.func @transform_1(%arg0: i32) -> (i32, i32) {
    %c0_i32 = arith.constant 0 : i32
    %c0_i32_0 = arith.constant 0 : i32
    %c0_i32_1 = arith.constant 0 : i32
    return %c0_i32, %c0_i32_0 : i32, i32
  }
  func.func @transform_2(%arg0: i32) -> (i32, i32) {
    %c0_i32 = arith.constant 0 : i32
    %c0_i32_0 = arith.constant 0 : i32
    %c0_i32_1 = arith.constant 0 : i32
    return %c0_i32, %c0_i32_0 : i32, i32
  }
  func.func @transform_3(%arg0: i32) -> (i32, i32) {
    %c0_i32 = arith.constant 0 : i32
    %c0_i32_0 = arith.constant 0 : i32
    %c0_i32_1 = arith.constant 0 : i32
    return %c0_i32, %c0_i32_0 : i32, i32
  }
  func.func @transform_4(%arg0: i32) -> (i32, i32) {
    %c0_i32 = arith.constant 0 : i32
    %c0_i32_0 = arith.constant 0 : i32
    %c0_i32_1 = arith.constant 0 : i32
    return %c0_i32, %c0_i32_0 : i32, i32
  }
  func.func @transform_5(%arg0: i32) -> (i32, i32) {
    %c0_i32 = arith.constant 0 : i32
    %c0_i32_0 = arith.constant 0 : i32
    %c0_i32_1 = arith.constant 0 : i32
    return %c0_i32, %c0_i32_0 : i32, i32
  }
  func.func @transform_6(%arg0: i32) -> (i32, i32) {
    %c0_i32 = arith.constant 0 : i32
    %c0_i32_0 = arith.constant 0 : i32
    %c0_i32_1 = arith.constant 0 : i32
    return %c0_i32, %c0_i32_0 : i32, i32
  }
  func.func @transform_7(%arg0: i32) -> (i32, i32) {
    %c0_i32 = arith.constant 0 : i32
    %c0_i32_0 = arith.constant 0 : i32
    return %arg0, %c0_i32 : i32, i32
  }
}

</mosaic_0001>

<bundles_post_ra>
// kernel: tpu_custom_call.1
= control target key start
LH: loop header
LB: loop body
LE: loop exit
PB: predicated region body
PF: predicated region fallthrough
CT: control target
= control target key end

     0   :  { %12 = vsyncpa [#allocation3], 0  ;;  %s701_s0 = inlined_call_operand.hbm [shape: f32[2,24], index: 0, kind: input, shape index: {}]   ;;  %s702_s1 = inlined_call_operand.hbm [shape: f32[24,32], index: 1, kind: input, shape index: {}]   ;;  %s703_s2 = inlined_call_operand.vmem [shape: f32[1,32], index: 2, kind: input, shape index: {}]   ;;  %s704_s3 = inlined_call_operand.hbm [shape: f32[32,32], index: 3, kind: input, shape index: {}]   ;;  %s705_s4 = inlined_call_operand.vmem [shape: f32[1,32], index: 4, kind: input, shape index: {}]   ;;  %s706_s5 = inlined_call_operand.hbm [shape: f32[32,128], index: 5, kind: input, shape index: {}]   ;;  %s707_s6 = inlined_call_operand.vmem [shape: f32[1,128], index: 6, kind: input, shape index: {}]   ;;  %s708_s7 = inlined_call_operand.hbm [shape: f32[2,2], index: 7, kind: output, shape index: {}]  }
   0x1   :  { %13 = vsyncpa [#allocation6], 0 }
   0x2   :  { %14 = vsyncpa [#allocation9], 0 }
   0x3   :  { %15 = vsyncpa [#allocation4], 0 }
   0x4   :  { %20 = vsyncadd [#allocation3], 96  ;;  %s555_s24 = smov [#allocation5]   ;;  %s437_s28 = scalar_lea.hbm %s702_s1, 384 }
   0x5   :  { %s33_s25 = sshll.u32 %s555_s24, 4  ;;  %p438_p0 = scmp.ne.s32.totalorder %s702_s1, %s437_s28  ;;  %s34_s25 = int_to_ptr.vmem [resolvable:$true] %s33_s25 }
   0x6   :  { %p441_p1 = scmp.lt.u32.totalorder %s437_s28, %s702_s1 }
   0x8   :  { %p443_p2 = pnand %p441_p1, %p438_p0 }
   0xa   :  { %446 = shalt.err (!%p443_p2)
}
   0xb   :  { %s447_s10 = scalar_lea.vmem %s34_s25, 384  ;;  %p452_p4 = scmp.lt.s32.totalorder %s34_s25, %s34_s25 }
   0xc   :  { %p448_p3 = scmp.ne.s32.totalorder %s34_s25, %s447_s10  ;;  %p453_p5 = scmp.lt.s32.totalorder %s447_s10, %s447_s10 }
   0xe   :  { %p454_p6 = por %p453_p5, %p452_p4 }
  0x10   :  { %p455_p7 = pnand %p454_p6, %p448_p3 }
  0x12   :  { %458 = shalt.err (!%p455_p7)
}
  0x13   :  { %s556_s11 = smov 128   ;;  %s557_s12 = smov 8  }
  0x14   :  { %39 = dma.hbm_to_vmem [thread:$0]  %s702_s1, 384, %s34_s25, [#allocation6], %s556_s11, %s556_s11, %s557_s12  }
  0x15   :  { %s558_s15 = smov [#allocation2]   ;;  %s459_s19 = scalar_lea.hbm %s701_s0, 32 }
  0x16   :  { %s21_s16 = sshll.u32 %s558_s15, 4  ;;  %p460_p8 = scmp.ne.s32.totalorder %s701_s0, %s459_s19  ;;  %s22_s16 = int_to_ptr.vmem [resolvable:$true] %s21_s16 }
  0x17   :  { %p463_p9 = scmp.lt.u32.totalorder %s459_s19, %s701_s0 }
  0x19   :  { %p465_p10 = pnand %p463_p9, %p460_p8 }
  0x1b   :  { %468 = shalt.err (!%p465_p10)
}
  0x1c   :  { %s469_s24 = scalar_lea.vmem %s22_s16, 32  ;;  %s473_s1 = scalar_lea.vmem %s22_s16, 128 }
  0x1d   :  { %p470_p11 = scmp.ne.s32.totalorder %s22_s16, %s469_s24  ;;  %p474_p12 = scmp.lt.s32.totalorder %s22_s16, %s22_s16 }
  0x1e   :  { %p475_p13 = scmp.lt.s32.totalorder %s473_s1, %s469_s24 }
  0x20   :  { %p476_p0 = por %p475_p13, %p474_p12 }
  0x22   :  { %p477_p1 = pnand %p476_p0, %p470_p11 }
  0x24   :  { %480 = shalt.err (!%p477_p1)
}
  0x25   :  { %s559_s25 = smov 32   ;;  %s560_s26 = smov 2  }
  0x26   :  { %27 = dma.hbm_to_vmem [thread:$0]  %s701_s0, 32, %s22_s16, [#allocation3], %s559_s25, %s559_s25, %s560_s26  }
  0x27   :  { %s561_s29 = smov [#allocation7]   ;;  %s562_s8 = smov [#allocation8]  }
  0x28   :  { %s47_s30 = sshll.u32 %s561_s29, 4  ;;  %s61_s9 = sshll.u32 %s562_s8, 4  ;;  %s48_s30 = int_to_ptr.vmem [resolvable:$true] %s47_s30  ;;  %s637_s9 = int_to_ptr.vmem [resolvable:$true] %s61_s9 }
  0x29   :  { %s481_s14 = scalar_lea.hbm %s704_s3, 512 }
  0x2a   :  { %p482_p2 = scmp.ne.s32.totalorder %s704_s3, %s481_s14  ;;  %p485_p3 = scmp.lt.u32.totalorder %s481_s14, %s704_s3 }
  0x2c   :  { %p487_p4 = pnand %p485_p3, %p482_p2 }
  0x2e   :  { %490 = shalt.err (!%p487_p4)
}
  0x2f   :  { %s491_s0 = scalar_lea.vmem %s48_s30, 512  ;;  %p496_p6 = scmp.lt.s32.totalorder %s48_s30, %s48_s30 }
  0x30   :  { %p492_p5 = scmp.ne.s32.totalorder %s48_s30, %s491_s0  ;;  %p497_p7 = scmp.lt.s32.totalorder %s491_s0, %s491_s0 }
  0x32   :  { %p498_p8 = por %p497_p7, %p496_p6 }
  0x34   :  { %p499_p9 = pnand %p498_p8, %p492_p5 }
  0x36   :  { %502 = shalt.err (!%p499_p9)
}
  0x37   :  { %53 = dma.hbm_to_vmem [thread:$0]  %s704_s3, 512, %s48_s30, [#allocation6], %s556_s11, %s556_s11, %s557_s12  }
  0x38   :  { %s503_s23 = scalar_lea.hbm %s706_s5, 512 }
  0x39   :  { %p504_p10 = scmp.ne.s32.totalorder %s706_s5, %s503_s23  ;;  %p507_p11 = scmp.lt.u32.totalorder %s503_s23, %s706_s5 }
  0x3b   :  { %p509_p12 = pnand %p507_p11, %p504_p10 }
  0x3d   :  { %512 = shalt.err (!%p509_p12)
}
  0x3e   :  { %s513_s29 = scalar_lea.vmem %s637_s9, 512  ;;  %p518_p0 = scmp.lt.s32.totalorder %s637_s9, %s637_s9 }
  0x3f   :  { %p514_p13 = scmp.ne.s32.totalorder %s637_s9, %s513_s29  ;;  %p519_p1 = scmp.lt.s32.totalorder %s513_s29, %s513_s29 }
  0x41   :  { %p520_p2 = por %p519_p1, %p518_p0 }
  0x43   :  { %p521_p3 = pnand %p520_p2, %p514_p13 }
  0x45   :  { %524 = shalt.err (!%p521_p3)
}
  0x46   :  { %67 = dma.hbm_to_vmem [thread:$0]  %s706_s5, 512, %s637_s9, [#allocation9], %s556_s11, %s556_s11, %s557_s12  }
  0x47   :  { %547 = dma.done.wait [#allocation3], 128  }
  0x48   :  { %548 = vsyncadd [#allocation3], 4294967168 }
  0x49   :  { %549 = dma.done.wait [#allocation6], 896  }
  0x4a   :  { %550 = vsyncadd [#allocation6], 4294966400 }
  0x4b   :  { %551 = dma.done.wait [#allocation9], 512  }
  0x4c   :  { %552 = vsyncadd [#allocation9], 4294966784  ;;  %v563_v0 = vmov 0.0|0.0   ;;  %vm564_vm0 = vmmov 0   ;;  %v565_v1 = vmov 0.0   ;;  %v83_v2 = vld [vmem:[#allocation5] sm:$0xff] }
  0x4d   :  { %410 = vmatprep.subr.bf16.mxu0 %v563_v0  ;;  %385 = vmatprep.mubr.msk.f32.mxu0 %vm564_vm0, %v565_v1  ;;  %v84_v3 = vld [vmem:[#allocation5 + $0x8] sm:$0xff]  ;;  %v168_v5 = vld [vmem:[#allocation7] sm:$0xff]  ;;  %v169_v6 = vld [vmem:[#allocation7 + $0x8] sm:$0xff]  ;;  %vm93_vm1 = vcmask 195584   ;;  %vm179_vm2 = vcmask 261120   ;;  %vm338_vm3 = vcmask 15360  }
  0x4e   :  { %413 = vmatprep.subr.bf16.mxu1 %v563_v0  ;;  %396 = vmatprep.mubr.msk.f32.mxu1 %vm564_vm0, %v565_v1  ;;  %v411_v4 = vpack.c.bf16 %v84_v3, %v83_v2  ;;  %v414_v7 = vpack.c.bf16 %v169_v6, %v168_v5  ;;  %v85_v8 = vld [vmem:[#allocation5 + $0x10] sm:$0xff]  ;;  %v82_v9 = vld [vmem:[#allocation2] sm:$0xff]  ;;  %v170_v10 = vld [vmem:[#allocation7 + $0x10] sm:$0xff] }
  0x4f   :  { %v171_v11 = vld [vmem:[#allocation7 + $0x18] sm:$0xff]  ;;  %v254_v13 = vld [vmem:[#allocation8] sm:$0xff]  ;;  %v255_v14 = vld [vmem:[#allocation8 + $0x8] sm:$0xff] }
  0x50   :  { %412 = vmatpush3.bf16.msra.mxu0 %v411_v4  ;;  %415 = vmatpush3.bf16.msra.mxu1 %v414_v7  ;;  %v417_v12 = vpack.c.bf16 %v171_v11, %v170_v10  ;;  %v420_v15 = vpack.c.bf16 %v255_v14, %v254_v13  ;;  %v359_v16 = vld [vmem:[%s703_s2] ss:$0 sm:$0xff]  ;;  %v256_v21 = vld [vmem:[#allocation8 + $0x10] sm:$0xff]  ;;  %v257_v22 = vld [vmem:[#allocation8 + $0x18] sm:$0xff] }
  0x51   :  { %383 = vmatprep.subr.mxu0 %v565_v1  ;;  %416 = vmatprep.subr.bf16.mxu1 %v563_v0  ;;  %v423_v23 = vpack.c.bf16 %v257_v22, %v256_v21  ;;  %v361_v24 = vld [vmem:[%s705_s4] ss:$0 sm:$0xff] }
  0x52   :  { %v363_v29 = vld [vmem:[%s707_s6] ss:$0 sm:$0xff] }
  0x54   :  { %384 = vmatpush3.msra.mxu0 %v85_v8  ;;  %418 = vmatpush3.bf16.msra.mxu1 %v417_v12 }
  0x55   :  { %386 = vmatmul.mubr.msk.f32.vlgmr.msra.gmra.mrb[0].mxu0 %vm93_vm1, %v82_v9  ;;  %419 = vmatprep.subr.bf16.mxu0 %v563_v0 }
  0x56   :  { %407 = vmatprep.mubr.msk.f32.mxu0 %vm564_vm0, %v565_v1  ;;  %421 = vmatpush3.bf16.msra.mxu0 %v420_v15 }
  0x57   :  { %422 = vmatprep.subr.bf16.mxu0 %v563_v0 }
  0x5a   :  { %424 = vmatpush3.bf16.msra.mxu0 %v423_v23 }
 0x128   :  { %v163_v17 = vpop.f32.mrb[0].mxu0 }
 0x129   :  { %v164_v18 = vadd.f32 %v359_v16, %v163_v17  ;;  %v387_v19 = vpop.f32.mrb[1].mxu0 }
 0x12b   :  { %v167_v20 = vmax.f32 %v164_v18, 0.0 }
 0x12d   :  { %397 = vmatmul.mubr.msk.f32.vlgmr.msra.gmra.mrb[0].mxu1 %vm179_vm2, %v167_v20 }
 0x200   :  { %v249_v25 = vpop.f32.mrb[0].mxu1 }
 0x201   :  { %v250_v26 = vadd.f32 %v361_v24, %v249_v25  ;;  %v398_v27 = vpop.f32.mrb[1].mxu1 }
 0x203   :  { %v253_v28 = vmax.f32 %v250_v26, 0.0 }
 0x205   :  { %408 = vmatmul.mubr.msk.f32.vlgmr.msra.gmra.mrb[2].mxu0 %vm179_vm2, %v253_v28 }
 0x2d8   :  { %v334_v30 = vpop.f32.mrb[2].mxu0 }
 0x2d9   :  { %v335_v31 = vadd.f32 %v363_v29, %v334_v30  ;;  %v409_v32 = vpop.f32.mrb[3].mxu0 }
 0x2db   :  { %339 = vst.msk [vmem:[#allocation10] sm:$0xff] %vm338_vm3, %v335_v31 }
 0x2dc   :  { %344 = vsyncadd [#allocation4], 96  ;;  %s566_s10 = smov [#allocation10]  }
 0x2dd   :  { %s345_s13 = sshll.u32 %s566_s10, 4  ;;  %s346_s13 = int_to_ptr.vmem [resolvable:$true] %s345_s13 }
 0x2de   :  { %s525_s14 = scalar_lea.vmem %s346_s13, 32  ;;  %s529_s4 = scalar_lea.vmem %s346_s13, 128 }
 0x2df   :  { %p526_p4 = scmp.ne.s32.totalorder %s346_s13, %s525_s14  ;;  %p530_p5 = scmp.lt.s32.totalorder %s346_s13, %s346_s13 }
 0x2e0   :  { %p531_p6 = scmp.lt.s32.totalorder %s529_s4, %s525_s14 }
 0x2e2   :  { %p532_p7 = por %p531_p6, %p530_p5 }
 0x2e4   :  { %p533_p8 = pnand %p532_p7, %p526_p4 }
 0x2e6   :  { %536 = shalt.err (!%p533_p8)
}
 0x2e7   :  { %s537_s6 = scalar_lea.hbm %s708_s7, 32 }
 0x2e8   :  { %p538_p9 = scmp.ne.s32.totalorder %s708_s7, %s537_s6  ;;  %p541_p10 = scmp.lt.u32.totalorder %s537_s6, %s708_s7 }
 0x2ea   :  { %p543_p11 = pnand %p541_p10, %p538_p9 }
 0x2ec   :  { %546 = shalt.err (!%p543_p11)
}
 0x2ed   :  { %351 = dma.vmem_to_hbm [thread:$0]  %s346_s13, 32, %s708_s7, [#allocation4], %s559_s25, %s559_s25, %s560_s26  }
 0x2ee   :  { %553 = dma.done.wait [#allocation4], 128  }
 0x2ef   :  { %554 = vsyncadd [#allocation4], 4294967168 }
 0x2f0   :  { %355 = vsyncpa [#allocation3], 1 }
 0x2f1   :  { %356 = vsyncpa [#allocation6], 1 }
 0x2f2   :  { %357 = vsyncpa [#allocation9], 1 }
 0x2f3   :  { %358 = vsyncpa [#allocation4], 1 }

</bundles_post_ra>
